<compile_context>
chip_gen: v7x
topology: tpu7x:2x2x1
jax: 0.10.0
libtpu: 0.0.40
codegen_flags: <defaults>
</compile_context>

<pallas_src>
import numpy as np
import jax
import jax.numpy as jnp
from jax import lax
from jax.experimental import pallas as pl
from jax.experimental.pallas import tpu as pltpu


def _make_kernel(C, H, W, compute_dtype):
    Hp, Wp = H + 2, W + 2
    N = H * Wp               # working slab length (valid pixels + 2 wrap cols/row)
    L = Hp * Wp + 2          # padded slab length (+2 keeps tap offset 2*Wp+2 in-bounds)

    def kernel(x_ref, w1_ref, w2_ref, mask_ref, o_ref, ybuf_ref):
        # x_ref   : (1, C, L)  zero-padded input, flattened row-major over (Hp, Wp)
        # w*_ref  : (9, C, C)  taps ordered (kh*3+kw, Cout, Cin), compute_dtype
        # mask_ref: (1, N)     1.0 on real pixels, 0.0 on the 2 wrap columns per row
        # o_ref   : (1, C, N)  output slab (flat, un-padded rows of width Wp)
        # ybuf_ref: (C, L)     VMEM scratch holding the re-padded SiLU(conv1) output
        x = x_ref[0]                                   # (C, L), input dtype (f32)
        xc = x.astype(compute_dtype)
        mask = mask_ref[...]                           # (1, N) f32

        # ---- conv1: 9 shifted (Cout,Cin)@(Cin,N) MXU matmuls, f32 accumulation ----
        acc = jnp.zeros((C, N), jnp.float32)
        for k in range(9):                             # static unrolled taps
            off = (k // 3) * Wp + (k % 3)              # static lane offset
            acc = acc + jnp.dot(w1_ref[k], xc[:, off:off + N],
                                preferred_element_type=jnp.float32)

        # ---- SiLU (f32); zero wrap columns so they act as conv2 padding ----
        y = acc * jax.nn.sigmoid(acc)
        y = y * mask

        # ---- re-pad: zeroed scratch, SiLU output written into the interior ----
        ybuf_ref[...] = jnp.zeros_like(ybuf_ref)
        ybuf_ref[:, pl.ds(Wp + 1, N)] = y.astype(compute_dtype)
        yb = ybuf_ref[...]                             # (C, L)

        # ---- conv2 (no activation) ----
        acc2 = jnp.zeros((C, N), jnp.float32)
        for k in range(9):
            off = (k // 3) * Wp + (k % 3)
            acc2 = acc2 + jnp.dot(w2_ref[k], yb[:, off:off + N],
                                  preferred_element_type=jnp.float32)

        # ---- residual add in f32, lane-dense store ----
        identity = x[:, Wp + 1:Wp + 1 + N].astype(jnp.float32)
        o_ref[0] = (identity + acc2).astype(o_ref.dtype)

    return kernel


def teco_resblock(x_nchw, w1_oihw, w2_oihw, *, compute_dtype=jnp.float32):
    """TecoResblock forward: x + conv3x3(SiLU(conv3x3(x, w1)), w2) (no bias/norm).

    x_nchw: (B, C, H, W); weights in PyTorch OIHW layout (C, C, 3, 3).
    compute_dtype: MXU operand dtype (jnp.float32, or jnp.bfloat16 on v6e/v7x);
    accumulation, SiLU and the residual add are always f32.
    """
    B, C, H, W = x_nchw.shape
    Hp, Wp = H + 2, W + 2
    N = H * Wp
    L = Hp * Wp + 2

    # HBM-side pre-padding + flattening (no in-kernel concat / reshape relayouts).
    xp = jnp.pad(x_nchw, ((0, 0), (0, 0), (1, 1), (1, 1)))
    xp_flat = jnp.pad(xp.reshape(B, C, Hp * Wp), ((0, 0), (0, 0), (0, 2)))

    # OIHW (Cout, Cin, kh, kw) -> (kh, kw, Cout, Cin) -> (9, Cout, Cin); cast once.
    w1 = jnp.transpose(w1_oihw, (2, 3, 0, 1)).reshape(9, C, C).astype(compute_dtype)
    w2 = jnp.transpose(w2_oihw, (2, 3, 0, 1)).reshape(9, C, C).astype(compute_dtype)

    # 1.0 on real pixels of each padded-width row, 0.0 on the two wrap columns.
    mask = jnp.asarray(np.arange(N) % Wp < W, dtype=jnp.float32).reshape(1, N)

    kernel = _make_kernel(C, H, W, compute_dtype)

    flops = B * 2 * (2 * 9 * C * C * H * W) + B * C * H * W       # 2 convs + residual
    bytes_accessed = (xp_flat.size * xp_flat.dtype.itemsize
                      + 2 * w1.size * w1.dtype.itemsize
                      + mask.size * 4
                      + B * C * N * x_nchw.dtype.itemsize)

    out_flat = pl.pallas_call(
        kernel,
        out_shape=jax.ShapeDtypeStruct((B, C, N), x_nchw.dtype),
        grid_spec=pltpu.PrefetchScalarGridSpec(
            num_scalar_prefetch=0,
            grid=(B,),
            in_specs=[
                pl.BlockSpec((1, C, L), lambda b: (b, 0, 0)),
                pl.BlockSpec((9, C, C), lambda b: (0, 0, 0)),
                pl.BlockSpec((9, C, C), lambda b: (0, 0, 0)),
                pl.BlockSpec((1, N), lambda b: (0, 0)),
            ],
            out_specs=pl.BlockSpec((1, C, N), lambda b: (b, 0, 0)),
            scratch_shapes=[pltpu.VMEM((C, L), compute_dtype)],
        ),
        compiler_params=pltpu.CompilerParams(
            dimension_semantics=("parallel",)),
        cost_estimate=pl.CostEstimate(
            flops=flops,
            transcendentals=B * C * H * W,
            bytes_accessed=bytes_accessed),
    )(xp_flat, w1, w2, mask)

    # (B, C, H*Wp) -> (B, C, H, Wp) -> drop the two wrap columns -> (B, C, H, W)
    return out_flat.reshape(B, C, H, Wp)[..., :W]


def _ref_forward(x_nchw, w1, w2):
    """Pure-JAX reference (lax conv) for correctness checking."""
    dn = lax.conv_dimension_numbers(x_nchw.shape, w1.shape,
                                    ("NCHW", "OIHW", "NCHW"))
    y = lax.conv_general_dilated(x_nchw, w1, (1, 1), ((1, 1), (1, 1)),
                                 dimension_numbers=dn)
    y = y * jax.nn.sigmoid(y)
    y = lax.conv_general_dilated(y, w2, (1, 1), ((1, 1), (1, 1)),
                                 dimension_numbers=dn)
    return x_nchw + y


if __name__ == "__main__":
    # Small shapes consistent with the module: nf channels, NCHW input.
    B, NF, H, W = 2, 8, 16, 16

    key = jax.random.PRNGKey(0)
    kx, k1, k2 = jax.random.split(key, 3)
    x = jax.random.normal(kx, (B, NF, H, W), dtype=jnp.float32)
    # Deterministic synthetic weights; weight_init_factor=0.1 -> small scale.
    w1 = 0.1 * jax.random.normal(k1, (NF, NF, 3, 3), dtype=jnp.float32)
    w2 = 0.1 * jax.random.normal(k2, (NF, NF, 3, 3), dtype=jnp.float32)

    ref = jax.block_until_ready(_ref_forward(x, w1, w2))

    # f32 MXU path: strict correctness check.
    out_f32 = jax.block_until_ready(
        teco_resblock(x, w1, w2, compute_dtype=jnp.float32))
    assert out_f32.shape == (B, NF, H, W) and out_f32.dtype == x.dtype
    np.testing.assert_allclose(np.asarray(out_f32), np.asarray(ref),
                               rtol=1e-4, atol=1e-4)

    # bf16 MXU operands / f32 accumulation (v6e/v7x fast path): loose sanity check.
    out_bf16 = jax.block_until_ready(
        teco_resblock(x, w1, w2, compute_dtype=jnp.bfloat16))
    assert out_bf16.shape == (B, NF, H, W) and out_bf16.dtype == x.dtype
    np.testing.assert_allclose(np.asarray(out_bf16), np.asarray(ref),
                               rtol=1e-1, atol=1e-1)

    print("KERNEL_OK")
</pallas_src>

<mosaic_0001>
module attributes {stable_mosaic.version = 11 : i64} {
  func.func @kernel(%arg0: i32, %arg1: memref<1x8x326xf32, #tpu.memory_space<vmem>>, %arg2: memref<9x8x8xf32, #tpu.memory_space<vmem>>, %arg3: memref<9x8x8xf32, #tpu.memory_space<vmem>>, %arg4: memref<1x288xf32, #tpu.memory_space<vmem>>, %arg5: memref<1x8x288xf32, #tpu.memory_space<vmem>>, %arg6: memref<8x326xf32, #tpu.memory_space<vmem>>) attributes {dimension_semantics = [#tpu.dimension_semantics<parallel>], iteration_bounds = array<i64: 2>, scalar_prefetch = 0 : i64, scratch_operands = 1 : i64, tpu.core_type = #tpu.core_type<tc>, window_params = [{transform_indices = @transform_0, window_bounds = array<i64: 1, 8, 326>}, {pipeline_mode = #tpu.pipeline_mode<synchronous>, transform_indices = @transform_1, window_bounds = array<i64: 9, 8, 8>}, {pipeline_mode = #tpu.pipeline_mode<synchronous>, transform_indices = @transform_2, window_bounds = array<i64: 9, 8, 8>}, {pipeline_mode = #tpu.pipeline_mode<synchronous>, transform_indices = @transform_3, window_bounds = array<i64: 1, 288>}, {transform_indices = @transform_4, window_bounds = array<i64: 1, 8, 288>}]} {
    %c0 = arith.constant 0 : index
    %c0_0 = arith.constant 0 : index
    %c0_1 = arith.constant 0 : index
    %0 = vector.load %arg1[%c0, %c0_0, %c0_1] : memref<1x8x326xf32, #tpu.memory_space<vmem>>, vector<1x8x326xf32>
    %1 = vector.shape_cast %0 : vector<1x8x326xf32> to vector<8x326xf32>
    %c0_2 = arith.constant 0 : index
    %c0_3 = arith.constant 0 : index
    %2 = vector.load %arg4[%c0_2, %c0_3] : memref<1x288xf32, #tpu.memory_space<vmem>>, vector<1x288xf32>
    %cst = arith.constant 0.000000e+00 : f32
    %3 = vector.broadcast %cst : f32 to vector<8x288xf32>
    %c0_4 = arith.constant 0 : index
    %c0_5 = arith.constant 0 : index
    %c0_6 = arith.constant 0 : index
    %4 = vector.load %arg2[%c0_4, %c0_5, %c0_6] : memref<9x8x8xf32, #tpu.memory_space<vmem>>, vector<1x8x8xf32>
    %5 = vector.shape_cast %4 : vector<1x8x8xf32> to vector<8x8xf32>
    %6 = vector.extract_strided_slice %1 {offsets = [0, 0], sizes = [8, 288], strides = [1, 1]} : vector<8x326xf32> to vector<8x288xf32>
    %cst_7 = arith.constant dense<0.000000e+00> : vector<8x288xf32>
    %7 = tpu.matmul %5, %6, %cst_7 {dimension_numbers = #tpu.dot_dimension_numbers<[1], [0], [0], [1], [0, 0, 1, 1], [], []>} : vector<8x8xf32>, vector<8x288xf32>, vector<8x288xf32> -> vector<8x288xf32>
    %8 = arith.addf %3, %7 : vector<8x288xf32>
    %c1 = arith.constant 1 : index
    %c0_8 = arith.constant 0 : index
    %c0_9 = arith.constant 0 : index
    %9 = vector.load %arg2[%c1, %c0_8, %c0_9] : memref<9x8x8xf32, #tpu.memory_space<vmem>>, vector<1x8x8xf32>
    %10 = vector.shape_cast %9 : vector<1x8x8xf32> to vector<8x8xf32>
    %11 = vector.extract_strided_slice %1 {offsets = [0, 1], sizes = [8, 288], strides = [1, 1]} : vector<8x326xf32> to vector<8x288xf32>
    %cst_10 = arith.constant dense<0.000000e+00> : vector<8x288xf32>
    %12 = tpu.matmul %10, %11, %cst_10 {dimension_numbers = #tpu.dot_dimension_numbers<[1], [0], [0], [1], [0, 0, 1, 1], [], []>} : vector<8x8xf32>, vector<8x288xf32>, vector<8x288xf32> -> vector<8x288xf32>
    %13 = arith.addf %8, %12 : vector<8x288xf32>
    %c2 = arith.constant 2 : index
    %c0_11 = arith.constant 0 : index
    %c0_12 = arith.constant 0 : index
    %14 = vector.load %arg2[%c2, %c0_11, %c0_12] : memref<9x8x8xf32, #tpu.memory_space<vmem>>, vector<1x8x8xf32>
    %15 = vector.shape_cast %14 : vector<1x8x8xf32> to vector<8x8xf32>
    %16 = vector.extract_strided_slice %1 {offsets = [0, 2], sizes = [8, 288], strides = [1, 1]} : vector<8x326xf32> to vector<8x288xf32>
    %cst_13 = arith.constant dense<0.000000e+00> : vector<8x288xf32>
    %17 = tpu.matmul %15, %16, %cst_13 {dimension_numbers = #tpu.dot_dimension_numbers<[1], [0], [0], [1], [0, 0, 1, 1], [], []>} : vector<8x8xf32>, vector<8x288xf32>, vector<8x288xf32> -> vector<8x288xf32>
    %18 = arith.addf %13, %17 : vector<8x288xf32>
    %c3 = arith.constant 3 : index
    %c0_14 = arith.constant 0 : index
    %c0_15 = arith.constant 0 : index
    %19 = vector.load %arg2[%c3, %c0_14, %c0_15] : memref<9x8x8xf32, #tpu.memory_space<vmem>>, vector<1x8x8xf32>
    %20 = vector.shape_cast %19 : vector<1x8x8xf32> to vector<8x8xf32>
    %21 = vector.extract_strided_slice %1 {offsets = [0, 18], sizes = [8, 288], strides = [1, 1]} : vector<8x326xf32> to vector<8x288xf32>
    %cst_16 = arith.constant dense<0.000000e+00> : vector<8x288xf32>
    %22 = tpu.matmul %20, %21, %cst_16 {dimension_numbers = #tpu.dot_dimension_numbers<[1], [0], [0], [1], [0, 0, 1, 1], [], []>} : vector<8x8xf32>, vector<8x288xf32>, vector<8x288xf32> -> vector<8x288xf32>
    %23 = arith.addf %18, %22 : vector<8x288xf32>
    %c4 = arith.constant 4 : index
    %c0_17 = arith.constant 0 : index
    %c0_18 = arith.constant 0 : index
    %24 = vector.load %arg2[%c4, %c0_17, %c0_18] : memref<9x8x8xf32, #tpu.memory_space<vmem>>, vector<1x8x8xf32>
    %25 = vector.shape_cast %24 : vector<1x8x8xf32> to vector<8x8xf32>
    %26 = vector.extract_strided_slice %1 {offsets = [0, 19], sizes = [8, 288], strides = [1, 1]} : vector<8x326xf32> to vector<8x288xf32>
    %cst_19 = arith.constant dense<0.000000e+00> : vector<8x288xf32>
    %27 = tpu.matmul %25, %26, %cst_19 {dimension_numbers = #tpu.dot_dimension_numbers<[1], [0], [0], [1], [0, 0, 1, 1], [], []>} : vector<8x8xf32>, vector<8x288xf32>, vector<8x288xf32> -> vector<8x288xf32>
    %28 = arith.addf %23, %27 : vector<8x288xf32>
    %c5 = arith.constant 5 : index
    %c0_20 = arith.constant 0 : index
    %c0_21 = arith.constant 0 : index
    %29 = vector.load %arg2[%c5, %c0_20, %c0_21] : memref<9x8x8xf32, #tpu.memory_space<vmem>>, vector<1x8x8xf32>
    %30 = vector.shape_cast %29 : vector<1x8x8xf32> to vector<8x8xf32>
    %31 = vector.extract_strided_slice %1 {offsets = [0, 20], sizes = [8, 288], strides = [1, 1]} : vector<8x326xf32> to vector<8x288xf32>
    %cst_22 = arith.constant dense<0.000000e+00> : vector<8x288xf32>
    %32 = tpu.matmul %30, %31, %cst_22 {dimension_numbers = #tpu.dot_dimension_numbers<[1], [0], [0], [1], [0, 0, 1, 1], [], []>} : vector<8x8xf32>, vector<8x288xf32>, vector<8x288xf32> -> vector<8x288xf32>
    %33 = arith.addf %28, %32 : vector<8x288xf32>
    %c6 = arith.constant 6 : index
    %c0_23 = arith.constant 0 : index
    %c0_24 = arith.constant 0 : index
    %34 = vector.load %arg2[%c6, %c0_23, %c0_24] : memref<9x8x8xf32, #tpu.memory_space<vmem>>, vector<1x8x8xf32>
    %35 = vector.shape_cast %34 : vector<1x8x8xf32> to vector<8x8xf32>
    %36 = vector.extract_strided_slice %1 {offsets = [0, 36], sizes = [8, 288], strides = [1, 1]} : vector<8x326xf32> to vector<8x288xf32>
    %cst_25 = arith.constant dense<0.000000e+00> : vector<8x288xf32>
    %37 = tpu.matmul %35, %36, %cst_25 {dimension_numbers = #tpu.dot_dimension_numbers<[1], [0], [0], [1], [0, 0, 1, 1], [], []>} : vector<8x8xf32>, vector<8x288xf32>, vector<8x288xf32> -> vector<8x288xf32>
    %38 = arith.addf %33, %37 : vector<8x288xf32>
    %c7 = arith.constant 7 : index
    %c0_26 = arith.constant 0 : index
    %c0_27 = arith.constant 0 : index
    %39 = vector.load %arg2[%c7, %c0_26, %c0_27] : memref<9x8x8xf32, #tpu.memory_space<vmem>>, vector<1x8x8xf32>
    %40 = vector.shape_cast %39 : vector<1x8x8xf32> to vector<8x8xf32>
    %41 = vector.extract_strided_slice %1 {offsets = [0, 37], sizes = [8, 288], strides = [1, 1]} : vector<8x326xf32> to vector<8x288xf32>
    %cst_28 = arith.constant dense<0.000000e+00> : vector<8x288xf32>
    %42 = tpu.matmul %40, %41, %cst_28 {dimension_numbers = #tpu.dot_dimension_numbers<[1], [0], [0], [1], [0, 0, 1, 1], [], []>} : vector<8x8xf32>, vector<8x288xf32>, vector<8x288xf32> -> vector<8x288xf32>
    %43 = arith.addf %38, %42 : vector<8x288xf32>
    %c8 = arith.constant 8 : index
    %c0_29 = arith.constant 0 : index
    %c0_30 = arith.constant 0 : index
    %44 = vector.load %arg2[%c8, %c0_29, %c0_30] : memref<9x8x8xf32, #tpu.memory_space<vmem>>, vector<1x8x8xf32>
    %45 = vector.shape_cast %44 : vector<1x8x8xf32> to vector<8x8xf32>
    %46 = vector.extract_strided_slice %1 {offsets = [0, 38], sizes = [8, 288], strides = [1, 1]} : vector<8x326xf32> to vector<8x288xf32>
    %cst_31 = arith.constant dense<0.000000e+00> : vector<8x288xf32>
    %47 = tpu.matmul %45, %46, %cst_31 {dimension_numbers = #tpu.dot_dimension_numbers<[1], [0], [0], [1], [0, 0, 1, 1], [], []>} : vector<8x8xf32>, vector<8x288xf32>, vector<8x288xf32> -> vector<8x288xf32>
    %48 = arith.addf %43, %47 : vector<8x288xf32>
    %49 = arith.negf %48 : vector<8x288xf32>
    %50 = math.exp %49 : vector<8x288xf32>
    %cst_32 = arith.constant 1.000000e+00 : f32
    %51 = vector.broadcast %cst_32 : f32 to vector<8x288xf32>
    %52 = arith.addf %51, %50 : vector<8x288xf32>
    %53 = arith.divf %51, %52 : vector<8x288xf32>
    %54 = arith.mulf %48, %53 : vector<8x288xf32>
    %55 = vector.broadcast %2 : vector<1x288xf32> to vector<8x288xf32>
    %56 = arith.mulf %54, %55 : vector<8x288xf32>
    %cst_33 = arith.constant 0.000000e+00 : f32
    %57 = vector.broadcast %cst_33 : f32 to vector<8x326xf32>
    %c0_34 = arith.constant 0 : index
    %c0_35 = arith.constant 0 : index
    %58 = vector.load %arg6[%c0_34, %c0_35] : memref<8x326xf32, #tpu.memory_space<vmem>>, vector<8x326xf32>
    tpu.vector_store %arg6[%c0_34, %c0_35], %57 {strides = array<i32>} : memref<8x326xf32, #tpu.memory_space<vmem>>, vector<8x326xf32>,
    %c0_36 = arith.constant 0 : index
    %c19 = arith.constant 19 : index
    %59 = vector.load %arg6[%c0_36, %c19] : memref<8x326xf32, #tpu.memory_space<vmem>>, vector<8x288xf32>
    tpu.vector_store %arg6[%c0_36, %c19], %56 {strides = array<i32>} : memref<8x326xf32, #tpu.memory_space<vmem>>, vector<8x288xf32>,
    %c0_37 = arith.constant 0 : index
    %c0_38 = arith.constant 0 : index
    %60 = vector.load %arg6[%c0_37, %c0_38] : memref<8x326xf32, #tpu.memory_space<vmem>>, vector<8x326xf32>
    %cst_39 = arith.constant 0.000000e+00 : f32
    %61 = vector.broadcast %cst_39 : f32 to vector<8x288xf32>
    %c0_40 = arith.constant 0 : index
    %c0_41 = arith.constant 0 : index
    %c0_42 = arith.constant 0 : index
    %62 = vector.load %arg3[%c0_40, %c0_41, %c0_42] : memref<9x8x8xf32, #tpu.memory_space<vmem>>, vector<1x8x8xf32>
    %63 = vector.shape_cast %62 : vector<1x8x8xf32> to vector<8x8xf32>
    %64 = vector.extract_strided_slice %60 {offsets = [0, 0], sizes = [8, 288], strides = [1, 1]} : vector<8x326xf32> to vector<8x288xf32>
    %cst_43 = arith.constant dense<0.000000e+00> : vector<8x288xf32>
    %65 = tpu.matmul %63, %64, %cst_43 {dimension_numbers = #tpu.dot_dimension_numbers<[1], [0], [0], [1], [0, 0, 1, 1], [], []>} : vector<8x8xf32>, vector<8x288xf32>, vector<8x288xf32> -> vector<8x288xf32>
    %66 = arith.addf %61, %65 : vector<8x288xf32>
    %c1_44 = arith.constant 1 : index
    %c0_45 = arith.constant 0 : index
    %c0_46 = arith.constant 0 : index
    %67 = vector.load %arg3[%c1_44, %c0_45, %c0_46] : memref<9x8x8xf32, #tpu.memory_space<vmem>>, vector<1x8x8xf32>
    %68 = vector.shape_cast %67 : vector<1x8x8xf32> to vector<8x8xf32>
    %69 = vector.extract_strided_slice %60 {offsets = [0, 1], sizes = [8, 288], strides = [1, 1]} : vector<8x326xf32> to vector<8x288xf32>
    %cst_47 = arith.constant dense<0.000000e+00> : vector<8x288xf32>
    %70 = tpu.matmul %68, %69, %cst_47 {dimension_numbers = #tpu.dot_dimension_numbers<[1], [0], [0], [1], [0, 0, 1, 1], [], []>} : vector<8x8xf32>, vector<8x288xf32>, vector<8x288xf32> -> vector<8x288xf32>
    %71 = arith.addf %66, %70 : vector<8x288xf32>
    %c2_48 = arith.constant 2 : index
    %c0_49 = arith.constant 0 : index
    %c0_50 = arith.constant 0 : index
    %72 = vector.load %arg3[%c2_48, %c0_49, %c0_50] : memref<9x8x8xf32, #tpu.memory_space<vmem>>, vector<1x8x8xf32>
    %73 = vector.shape_cast %72 : vector<1x8x8xf32> to vector<8x8xf32>
    %74 = vector.extract_strided_slice %60 {offsets = [0, 2], sizes = [8, 288], strides = [1, 1]} : vector<8x326xf32> to vector<8x288xf32>
    %cst_51 = arith.constant dense<0.000000e+00> : vector<8x288xf32>
    %75 = tpu.matmul %73, %74, %cst_51 {dimension_numbers = #tpu.dot_dimension_numbers<[1], [0], [0], [1], [0, 0, 1, 1], [], []>} : vector<8x8xf32>, vector<8x288xf32>, vector<8x288xf32> -> vector<8x288xf32>
    %76 = arith.addf %71, %75 : vector<8x288xf32>
    %c3_52 = arith.constant 3 : index
    %c0_53 = arith.constant 0 : index
    %c0_54 = arith.constant 0 : index
    %77 = vector.load %arg3[%c3_52, %c0_53, %c0_54] : memref<9x8x8xf32, #tpu.memory_space<vmem>>, vector<1x8x8xf32>
    %78 = vector.shape_cast %77 : vector<1x8x8xf32> to vector<8x8xf32>
    %79 = vector.extract_strided_slice %60 {offsets = [0, 18], sizes = [8, 288], strides = [1, 1]} : vector<8x326xf32> to vector<8x288xf32>
    %cst_55 = arith.constant dense<0.000000e+00> : vector<8x288xf32>
    %80 = tpu.matmul %78, %79, %cst_55 {dimension_numbers = #tpu.dot_dimension_numbers<[1], [0], [0], [1], [0, 0, 1, 1], [], []>} : vector<8x8xf32>, vector<8x288xf32>, vector<8x288xf32> -> vector<8x288xf32>
    %81 = arith.addf %76, %80 : vector<8x288xf32>
    %c4_56 = arith.constant 4 : index
    %c0_57 = arith.constant 0 : index
    %c0_58 = arith.constant 0 : index
    %82 = vector.load %arg3[%c4_56, %c0_57, %c0_58] : memref<9x8x8xf32, #tpu.memory_space<vmem>>, vector<1x8x8xf32>
    %83 = vector.shape_cast %82 : vector<1x8x8xf32> to vector<8x8xf32>
    %84 = vector.extract_strided_slice %60 {offsets = [0, 19], sizes = [8, 288], strides = [1, 1]} : vector<8x326xf32> to vector<8x288xf32>
    %cst_59 = arith.constant dense<0.000000e+00> : vector<8x288xf32>
    %85 = tpu.matmul %83, %84, %cst_59 {dimension_numbers = #tpu.dot_dimension_numbers<[1], [0], [0], [1], [0, 0, 1, 1], [], []>} : vector<8x8xf32>, vector<8x288xf32>, vector<8x288xf32> -> vector<8x288xf32>
    %86 = arith.addf %81, %85 : vector<8x288xf32>
    %c5_60 = arith.constant 5 : index
    %c0_61 = arith.constant 0 : index
    %c0_62 = arith.constant 0 : index
    %87 = vector.load %arg3[%c5_60, %c0_61, %c0_62] : memref<9x8x8xf32, #tpu.memory_space<vmem>>, vector<1x8x8xf32>
    %88 = vector.shape_cast %87 : vector<1x8x8xf32> to vector<8x8xf32>
    %89 = vector.extract_strided_slice %60 {offsets = [0, 20], sizes = [8, 288], strides = [1, 1]} : vector<8x326xf32> to vector<8x288xf32>
    %cst_63 = arith.constant dense<0.000000e+00> : vector<8x288xf32>
    %90 = tpu.matmul %88, %89, %cst_63 {dimension_numbers = #tpu.dot_dimension_numbers<[1], [0], [0], [1], [0, 0, 1, 1], [], []>} : vector<8x8xf32>, vector<8x288xf32>, vector<8x288xf32> -> vector<8x288xf32>
    %91 = arith.addf %86, %90 : vector<8x288xf32>
    %c6_64 = arith.constant 6 : index
    %c0_65 = arith.constant 0 : index
    %c0_66 = arith.constant 0 : index
    %92 = vector.load %arg3[%c6_64, %c0_65, %c0_66] : memref<9x8x8xf32, #tpu.memory_space<vmem>>, vector<1x8x8xf32>
    %93 = vector.shape_cast %92 : vector<1x8x8xf32> to vector<8x8xf32>
    %94 = vector.extract_strided_slice %60 {offsets = [0, 36], sizes = [8, 288], strides = [1, 1]} : vector<8x326xf32> to vector<8x288xf32>
    %cst_67 = arith.constant dense<0.000000e+00> : vector<8x288xf32>
    %95 = tpu.matmul %93, %94, %cst_67 {dimension_numbers = #tpu.dot_dimension_numbers<[1], [0], [0], [1], [0, 0, 1, 1], [], []>} : vector<8x8xf32>, vector<8x288xf32>, vector<8x288xf32> -> vector<8x288xf32>
    %96 = arith.addf %91, %95 : vector<8x288xf32>
    %c7_68 = arith.constant 7 : index
    %c0_69 = arith.constant 0 : index
    %c0_70 = arith.constant 0 : index
    %97 = vector.load %arg3[%c7_68, %c0_69, %c0_70] : memref<9x8x8xf32, #tpu.memory_space<vmem>>, vector<1x8x8xf32>
    %98 = vector.shape_cast %97 : vector<1x8x8xf32> to vector<8x8xf32>
    %99 = vector.extract_strided_slice %60 {offsets = [0, 37], sizes = [8, 288], strides = [1, 1]} : vector<8x326xf32> to vector<8x288xf32>
    %cst_71 = arith.constant dense<0.000000e+00> : vector<8x288xf32>
    %100 = tpu.matmul %98, %99, %cst_71 {dimension_numbers = #tpu.dot_dimension_numbers<[1], [0], [0], [1], [0, 0, 1, 1], [], []>} : vector<8x8xf32>, vector<8x288xf32>, vector<8x288xf32> -> vector<8x288xf32>
    %101 = arith.addf %96, %100 : vector<8x288xf32>
    %c8_72 = arith.constant 8 : index
    %c0_73 = arith.constant 0 : index
    %c0_74 = arith.constant 0 : index
    %102 = vector.load %arg3[%c8_72, %c0_73, %c0_74] : memref<9x8x8xf32, #tpu.memory_space<vmem>>, vector<1x8x8xf32>
    %103 = vector.shape_cast %102 : vector<1x8x8xf32> to vector<8x8xf32>
    %104 = vector.extract_strided_slice %60 {offsets = [0, 38], sizes = [8, 288], strides = [1, 1]} : vector<8x326xf32> to vector<8x288xf32>
    %cst_75 = arith.constant dense<0.000000e+00> : vector<8x288xf32>
    %105 = tpu.matmul %103, %104, %cst_75 {dimension_numbers = #tpu.dot_dimension_numbers<[1], [0], [0], [1], [0, 0, 1, 1], [], []>} : vector<8x8xf32>, vector<8x288xf32>, vector<8x288xf32> -> vector<8x288xf32>
    %106 = arith.addf %101, %105 : vector<8x288xf32>
    %107 = vector.extract_strided_slice %1 {offsets = [0, 19], sizes = [8, 288], strides = [1, 1]} : vector<8x326xf32> to vector<8x288xf32>
    %108 = arith.addf %107, %106 : vector<8x288xf32>
    %c0_76 = arith.constant 0 : index
    %c0_77 = arith.constant 0 : index
    %c0_78 = arith.constant 0 : index
    %109 = vector.load %arg5[%c0_76, %c0_77, %c0_78] : memref<1x8x288xf32, #tpu.memory_space<vmem>>, vector<1x8x288xf32>
    %110 = vector.shape_cast %109 : vector<1x8x288xf32> to vector<8x288xf32>
    %111 = vector.shape_cast %108 : vector<8x288xf32> to vector<1x8x288xf32>
    tpu.vector_store %arg5[%c0_76, %c0_77, %c0_78], %111 {strides = array<i32>} : memref<1x8x288xf32, #tpu.memory_space<vmem>>, vector<1x8x288xf32>,
    return
  }
  func.func @transform_0(%arg0: i32) -> (i32, i32, i32) {
    %c0_i32 = arith.constant 0 : i32
    %c0_i32_0 = arith.constant 0 : i32
    %c0_i32_1 = arith.constant 0 : i32
    return %arg0, %c0_i32, %c0_i32_0 : i32, i32, i32
  }
  func.func @transform_1(%arg0: i32) -> (i32, i32, i32) {
    %c0_i32 = arith.constant 0 : i32
    %c0_i32_0 = arith.constant 0 : i32
    %c0_i32_1 = arith.constant 0 : i32
    %c0_i32_2 = arith.constant 0 : i32
    return %c0_i32, %c0_i32_0, %c0_i32_1 : i32, i32, i32
  }
  func.func @transform_2(%arg0: i32) -> (i32, i32, i32) {
    %c0_i32 = arith.constant 0 : i32
    %c0_i32_0 = arith.constant 0 : i32
    %c0_i32_1 = arith.constant 0 : i32
    %c0_i32_2 = arith.constant 0 : i32
    return %c0_i32, %c0_i32_0, %c0_i32_1 : i32, i32, i32
  }
  func.func @transform_3(%arg0: i32) -> (i32, i32) {
    %c0_i32 = arith.constant 0 : i32
    %c0_i32_0 = arith.constant 0 : i32
    %c0_i32_1 = arith.constant 0 : i32
    return %c0_i32, %c0_i32_0 : i32, i32
  }
  func.func @transform_4(%arg0: i32) -> (i32, i32, i32) {
    %c0_i32 = arith.constant 0 : i32
    %c0_i32_0 = arith.constant 0 : i32
    %c0_i32_1 = arith.constant 0 : i32
    return %arg0, %c0_i32, %c0_i32_0 : i32, i32, i32
  }
}

</mosaic_0001>

<bundles_post_ra>
// kernel: tpu_custom_call.1
= control target key start
LH: loop header
LB: loop body
LE: loop exit
PB: predicated region body
PF: predicated region fallthrough
CT: control target
= control target key end

     0   :  { %9 = vsyncpa [#allocation4], 0  ;;  %s4052_s0 = inlined_call_operand.vmem [shape: f32[2,8,326], index: 0, kind: input, shape index: {}]   ;;  %s4053_s1 = inlined_call_operand.vmem [shape: f32[9,8,8], index: 1, kind: input, shape index: {}]   ;;  %s4054_s2 = inlined_call_operand.vmem [shape: f32[9,8,8], index: 2, kind: input, shape index: {}]   ;;  %s4055_s3 = inlined_call_operand.vmem [shape: f32[1,288], index: 3, kind: input, shape index: {}]   ;;  %s4056_s4 = inlined_call_operand.hbm [shape: f32[2,8,288], index: 4, kind: output, shape index: {}]  }
   0x1   :  { %11 = vsyncpa [#allocation4 + $0x1], 0  ;;  %s3654_s15 = smov 0   ;;  %s3656_s16 = smov 0  }
   0x2   :  { %s3658_s17 = smov 0   ;;  %s3660_s18 = smov 0  }
   0x3 LB: > { %s3675_s19 = sadd.s32 4294967295, %s3615_s18   ;;  %s3235_s20 = sadd.s32 4294967294, %s3615_s18   ;;  %s3615_s18 = sphi %s3660_s18, %s4062_s18   ;;  %s3611_s17 = sphi %s3658_s17, %s4061_s17   ;;  %s3607_s16 = sphi %s3656_s16, %s4060_s16   ;;  %s3603_s15 = sphi %s3654_s15, %s4059_s15  }
   0x4   : > { %s3679_s21 = sadd.s32 1, %s3615_s18   ;;  %s113_s22 = sadd.s32 1, %s3611_s17 }
   0x5   : > { %s110_s23 = ssub.s32 %s3615_s18, %s3679_s21  ;;  %p123_p0 = scmp.ne.s32.totalorder %s3611_s17, %s3607_s16 }
   0x6   : > { %p111_p1 = scmp.eq.s32.totalorder %s110_s23, 0  ;;  %p124_p2 = scmp.eq.s32.totalorder %s3675_s19, 1 }
   0x7   : > { %p129_p3 = scmp.ne.s32.totalorder %s3607_s16, %s3603_s15  ;;  %p130_p4 = scmp.eq.s32.totalorder %s3235_s20, 1 }
   0x8   : > { %s3690_s24 = scalar_select %p111_p1, %s3611_s17, %s113_s22  }
   0x9   : > { %p3692_p5 = por %p124_p2, %p123_p0  ;;  %p3696_p6 = por %p130_p4, %p129_p3 }
   0xa   : > { %p3238_p7 = scmp.ge.s32.totalorder %s3615_s18, 1  ;;  %p165_p8 = scmp.lt.s32.totalorder %s3615_s18, 3 }
   0xc   : > { %p166_p9 = pnand %p3238_p7, %p165_p8 }
   0xd   : > { %p191_p10 = scmp.lt.s32.totalorder (!%p166_p9), %s3675_s19, 1  ;;  %v3617_v0 = vmov (!%p166_p9), 0.0   ;;  %vm3618_vm0 = vmmov (!%p166_p9), 0   ;;  %s3619_s6 = smov (!%p166_p9), 127   ;;  %vm212_vm1 = vcmask (!%p166_p9), 1039360   ;;  %v3240_v6 = vld [vmem:[%s4053_s1 + $0x8] sm:$0xff] (!%p166_p9) }
   0xe   : > { %169 = sbr.rel (%p166_p9) target bundleno = 1229 (0x4cd), region = 36  ;;  %3334 = vmatprep.subr.mxu1 (!%p166_p9), %v3617_v0  ;;  %1674 = vst [vmem:[#allocation2] sm:$0xff] (!%p166_p9), %v3617_v0  ;;  %3336 = vmatprep.mubr.msk.f32.mxu1 (!%p166_p9), %vm3618_vm0, %v3617_v0  ;;  %s3620_s7 = smov (!%p166_p9), 126   ;;  %vm218_vm2 = vcmask (!%p166_p9), 64512   ;;  %vm515_vm3 = vcmask (!%p166_p9), 1031168   ;;  %v200_v14 = vld [vmem:[%s4053_s1] sm:$0xff] (!%p166_p9) }
   0xf   : > { %286 = vmatprep.mubr.f32.mxu0 (!%p166_p9), %v3617_v0  ;;  %s3621_s8 = smov (!%p166_p9), 110   ;;  %s3622_s9 = smov (!%p166_p9), 109   ;;  %vm676_vm4 = vcmask (!%p166_p9), 900096   ;;  %v3245_v21 = vld [vmem:[%s4053_s1 + $0x10] sm:$0xff] (!%p166_p9)  ;;  %vm837_vm5 = vcmask (!%p166_p9), 891904   ;;  %v3248_v27 = vld [vmem:[%s4053_s1 + $0x18] sm:$0xff] (!%p166_p9) }
  0x10   : > { %s3623_s10 = smov (!%p166_p9), 108   ;;  %s3624_s11 = smov (!%p166_p9), 92   ;;  %vm998_vm6 = vcmask (!%p166_p9), 883712   ;;  %v3251_v33 = vld [vmem:[%s4053_s1 + $0x20] sm:$0xff] (!%p166_p9)  ;;  %vm1159_vm7 = vcmask (!%p166_p9), 752640   ;;  %v3254_v39 = vld [vmem:[%s4053_s1 + $0x28] sm:$0xff] (!%p166_p9) }
  0x11   : > { %s3625_s12 = smov (!%p166_p9), 91   ;;  %s3626_s13 = smov (!%p166_p9), 90   ;;  %vm1320_vm8 = vcmask (!%p166_p9), 744448   ;;  %v3257_v44 = vld [vmem:[%s4053_s1 + $0x30] sm:$0xff] (!%p166_p9)  ;;  %vm1481_vm9 = vcmask (!%p166_p9), 736256   ;;  %v3260_v50 = vld [vmem:[%s4053_s1 + $0x38] sm:$0xff] (!%p166_p9) }
  0x12   : > { %v3263_v52 = vld [vmem:[%s4053_s1 + $0x40] sm:$0xff] (!%p166_p9)  ;;  %vm1676_vm10 = vcmask (!%p166_p9), 572416   ;;  %s3627_s22 = smov (!%p166_p9), 19   ;;  %vm1693_vm11 = vcmask (!%p166_p9), 1047704   ;;  %vm1687_vm12 = vcmask (!%p166_p9), 154624   ;;  %vm1696_vm13 = vcmask (!%p166_p9), 416768  }
  0x13   : > { %1677 = vst.msk [vmem:[#allocation2 + $0x10] sm:$0xff] (!%p166_p9), %vm1676_vm10, %v3617_v0  ;;  %vm3159_vm14 = vcmask (!%p166_p9), 261120   ;;  %s3628_s29 = smov (!%p166_p9), [#allocation3]  }
  0x14   : > { %s3557_s30 = sshll.u32 (!%p166_p9), %s3628_s29, 4  ;;  %s3558_s30 = int_to_ptr.vmem [resolvable:$false] %s3557_s30 }
  0x15   : > { %s192_s27 = scalar_select %p191_p10, %s3675_s19, 1 }
  0x17   : > { %s3489_s28 = smul.u32 24, %s192_s27 }
  0x19   : > { %s195_s5 = scalar_lea.vmem %s4052_s0, %s3489_s28 }
  0x1a   : > { %v3712_v1 = vld [vmem:[%s195_s5 + $0x8] sm:$0xff]  ;;  %v3714_v2 = vld [vmem:[%s195_s5] sm:$0xff]  ;;  %v3720_v3 = vld [vmem:[%s195_s5 + $0x10] sm:$0xff]  ;;  %s3559_s5 = scalar_lea.vmem %s3558_s30, 768 }
  0x1b   : > { %208 = vrot.lane.b32.xlu0 %v3712_v1, %s3619_s6  ;;  %206 = vrot.lane.b32.xlu1 %v3714_v2, %s3619_s6 }
  0x1f   : > { %210 = vrot.lane.b32.xlu0 %v3720_v3, %s3619_s6  ;;  %511 = vrot.lane.b32.xlu1 %v3712_v1, %s3620_s7 }
  0x23   : > { %513 = vrot.lane.b32.xlu0 %v3720_v3, %s3620_s7  ;;  %509 = vrot.lane.b32.xlu1 %v3714_v2, %s3620_s7 }
  0x27   : > { %672 = vrot.lane.b32.xlu0 %v3712_v1, %s3621_s8  ;;  %674 = vrot.lane.b32.xlu1 %v3720_v3, %s3621_s8 }
  0x2b   : > { %670 = vrot.lane.b32.xlu0 %v3714_v2, %s3621_s8  ;;  %833 = vrot.lane.b32.xlu1 %v3712_v1, %s3622_s9 }
  0x2f   : > { %835 = vrot.lane.b32.xlu0 %v3720_v3, %s3622_s9  ;;  %831 = vrot.lane.b32.xlu1 %v3714_v2, %s3622_s9 }
  0x33   : > { %994 = vrot.lane.b32.xlu0 %v3712_v1, %s3623_s10  ;;  %996 = vrot.lane.b32.xlu1 %v3720_v3, %s3623_s10 }
  0x37   : > { %992 = vrot.lane.b32.xlu0 %v3714_v2, %s3623_s10  ;;  %1155 = vrot.lane.b32.xlu1 %v3712_v1, %s3624_s11 }
  0x3b   : > { %1157 = vrot.lane.b32.xlu0 %v3720_v3, %s3624_s11  ;;  %1153 = vrot.lane.b32.xlu1 %v3714_v2, %s3624_s11 }
  0x3f   : > { %1316 = vrot.lane.b32.xlu0 %v3712_v1, %s3625_s12  ;;  %1318 = vrot.lane.b32.xlu1 %v3720_v3, %s3625_s12 }
  0x43   : > { %1314 = vrot.lane.b32.xlu0 %v3714_v2, %s3625_s12  ;;  %1477 = vrot.lane.b32.xlu1 %v3712_v1, %s3626_s13 }
  0x47   : > { %1479 = vrot.lane.b32.xlu0 %v3720_v3, %s3626_s13  ;;  %1475 = vrot.lane.b32.xlu1 %v3714_v2, %s3626_s13 }
  0x8d   : > { %v209_v4 = vpop.permute.xlu0 %208  ;;  %v207_v5 = vpop.permute.xlu1 %206 }
  0x8e   : > { %v213_v10 = vsel %vm212_vm1, %v207_v5, %v209_v4  ;;  %v1656_v5 = vlaneseq }
  0x91   : > { %v211_v7 = vpop.permute.xlu0 %210  ;;  %v512_v8 = vpop.permute.xlu1 %511 }
  0x92   : > { %3335 = vmatpush3.msra.mxu1 %v211_v7  ;;  %v214_v9 = vsel %vm212_vm1, %v209_v4, %v211_v7  ;;  %v1657_v7 = vshrl.u32 %v1656_v5, 7  ;;  %v3283_v5 = vld [vmem:[%s4054_s2 + $0x28] sm:$0xff] }
  0x93   : > { %222 = vmatprep.subr.mxu0 %v214_v9  ;;  %3337 = vmatmul.mubr.msk.f32.vlgmr.msra.gmra.mrb[0].mxu1 %vm218_vm2, %v3240_v6 }
  0x94   : > { %223 = vmatpush1.msra.mxu0 %v213_v10  ;;  %3339 = vmatprep.subr.mxu1 %v3617_v0  ;;  %v1662_v9 = vsub.s32 1, %v1657_v7  ;;  %v199_v10 = vld [vmem:[%s4055_s3] sm:$0x7] }
  0x95   : > { %3241 = vmatmul.mubr.msk.f32.vlgmr.msra.gmra.mrb[0].mxu0 %vm218_vm2, %v3240_v6  ;;  %366 = vmatprep.subr.mxu0 %v3712_v1  ;;  %v514_v11 = vpop.permute.xlu0 %513  ;;  %v510_v12 = vpop.permute.xlu1 %509 }
  0x96   : > { %367 = vmatpush1.msra.mxu0 %v3714_v2  ;;  %3340 = vmatpush3.msra.mxu1 %v3720_v3  ;;  %v517_v13 = vsel %vm515_vm3, %v512_v8, %v514_v11  ;;  %v516_v17 = vsel %vm515_vm3, %v510_v12, %v512_v8  ;;  %v1658_v8 = vsub.s32 0, %v1657_v7  ;;  %v1666_v12 = vsub.s32 2, %v1657_v7 }
  0x97   : > { %3341 = vmatprep.mubr.msk.f32.mxu1 %vm3618_vm0, %v3617_v0  ;;  %430 = vmatprep.mubr.f32.mxu0 %v3617_v0 }
  0x98   : > { %524 = vmatprep.subr.mxu0 %v517_v13  ;;  %3344 = vmatprep.subr.mxu1 %v3617_v0  ;;  %v1659_v13 = vrot.slane %v199_v10, %v1658_v8 }
  0x99   : > { %v673_v15 = vpop.permute.xlu0 %672  ;;  %v675_v16 = vpop.permute.xlu1 %674 }
  0x9a   : > { %v678_v18 = vsel %vm676_vm4, %v673_v15, %v675_v16 }
  0x9b   : > { %3342 = vmatmul.mubr.msk.f32.vlgmr.msra.gmra.mrb[0].mxu1 %vm218_vm2, %v200_v14 }
  0x9c   : > { %3345 = vmatpush3.msra.mxu1 %v514_v11  ;;  %3346 = vmatprep.mubr.msk.f32.mxu1 %vm3618_vm0, %v3617_v0 }
  0x9d   : > { %3243 = vmatmul.mubr.msk.f32.vlgmr.msra.gmra.mrb[0].mxu0 %vm218_vm2, %v200_v14  ;;  %v671_v19 = vpop.permute.xlu0 %670  ;;  %3349 = vmatprep.subr.mxu1 %v3617_v0  ;;  %v834_v20 = vpop.permute.xlu1 %833 }
  0x9e   : > { %525 = vmatpush1.msra.mxu0 %v516_v17  ;;  %588 = vmatprep.mubr.f32.mxu0 %v3617_v0  ;;  %v677_v23 = vsel %vm676_vm4, %v671_v19, %v673_v15  ;;  %v1663_v15 = vrot.slane %v199_v10, %v1662_v9 }
  0x9f   : > { %685 = vmatprep.subr.mxu0 %v678_v18 }
  0xa1   : > { %v836_v22 = vpop.permute.xlu0 %835  ;;  %v832_v25 = vpop.permute.xlu1 %831 }
  0xa2   : > { %v839_v24 = vsel %vm837_vm5, %v834_v20, %v836_v22  ;;  %v838_v29 = vsel %vm837_vm5, %v832_v25, %v834_v20  ;;  %v1667_v20 = vrot.slane %v199_v10, %v1666_v12 }
  0xa3   : > { %3347 = vmatmul.mubr.msk.f32.vlgmr.msra.gmra.mrb[0].mxu1 %vm218_vm2, %v3245_v21 }
  0xa4   : > { %3350 = vmatpush3.msra.mxu1 %v675_v16  ;;  %3351 = vmatprep.mubr.msk.f32.mxu1 %vm3618_vm0, %v3617_v0 }
  0xa5   : > { %3246 = vmatmul.mubr.msk.f32.vlgmr.msra.gmra.mrb[0].mxu0 %vm218_vm2, %v3245_v21  ;;  %3354 = vmatprep.subr.mxu1 %v3617_v0  ;;  %v995_v26 = vpop.permute.xlu0 %994  ;;  %v997_v28 = vpop.permute.xlu1 %996 }
  0xa6   : > { %686 = vmatpush1.msra.mxu0 %v677_v23  ;;  %749 = vmatprep.mubr.f32.mxu0 %v3617_v0  ;;  %v1000_v30 = vsel %vm998_vm6, %v995_v26, %v997_v28 }
  0xa7   : > { %846 = vmatprep.subr.mxu0 %v839_v24 }
  0xa9   : > { %v993_v31 = vpop.permute.xlu0 %992  ;;  %v1156_v32 = vpop.permute.xlu1 %1155 }
  0xaa   : > { %v999_v35 = vsel %vm998_vm6, %v993_v31, %v995_v26 }
  0xab   : > { %3352 = vmatmul.mubr.msk.f32.vlgmr.msra.gmra.mrb[0].mxu1 %vm218_vm2, %v3248_v27 }
  0xac   : > { %3355 = vmatpush3.msra.mxu1 %v836_v22  ;;  %3356 = vmatprep.mubr.msk.f32.mxu1 %vm3618_vm0, %v3617_v0 }
  0xad   : > { %3249 = vmatmul.mubr.msk.f32.vlgmr.msra.gmra.mrb[0].mxu0 %vm218_vm2, %v3248_v27  ;;  %3359 = vmatprep.subr.mxu1 %v3617_v0  ;;  %v1158_v34 = vpop.permute.xlu0 %1157  ;;  %v1154_v37 = vpop.permute.xlu1 %1153 }
  0xae   : > { %847 = vmatpush1.msra.mxu0 %v838_v29  ;;  %910 = vmatprep.mubr.f32.mxu0 %v3617_v0  ;;  %v1161_v36 = vsel %vm1159_vm7, %v1156_v32, %v1158_v34  ;;  %v1160_v41 = vsel %vm1159_vm7, %v1154_v37, %v1156_v32 }
  0xaf   : > { %1007 = vmatprep.subr.mxu0 %v1000_v30 }
  0xb1   : > { %v1317_v38 = vpop.permute.xlu0 %1316  ;;  %v1319_v40 = vpop.permute.xlu1 %1318 }
  0xb2   : > { %v1322_v42 = vsel %vm1320_vm8, %v1317_v38, %v1319_v40 }
  0xb3   : > { %3357 = vmatmul.mubr.msk.f32.vlgmr.msra.gmra.mrb[0].mxu1 %vm218_vm2, %v3251_v33 }
  0xb4   : > { %3360 = vmatpush3.msra.mxu1 %v997_v28  ;;  %3361 = vmatprep.mubr.msk.f32.mxu1 %vm3618_vm0, %v3617_v0 }
  0xb5   : > { %3252 = vmatmul.mubr.msk.f32.vlgmr.msra.gmra.mrb[0].mxu0 %vm218_vm2, %v3251_v33  ;;  %3364 = vmatprep.subr.mxu1 %v3617_v0  ;;  %v1315_v43 = vpop.permute.xlu0 %1314  ;;  %v1478_v46 = vpop.permute.xlu1 %1477  ;;  %v3269_v33 = vld [vmem:[%s4054_s2 + $0x8] sm:$0xff] }
  0xb6   : > { %1008 = vmatpush1.msra.mxu0 %v999_v35  ;;  %1071 = vmatprep.mubr.f32.mxu0 %v3617_v0  ;;  %v1321_v47 = vsel %vm1320_vm8, %v1315_v43, %v1317_v38 }
  0xb7   : > { %1168 = vmatprep.subr.mxu0 %v1161_v36 }
  0xb9   : > { %v1480_v45 = vpop.permute.xlu0 %1479  ;;  %v1476_v49 = vpop.permute.xlu1 %1475 }
  0xba   : > { %v1483_v48 = vsel %vm1481_vm9, %v1478_v46, %v1480_v45  ;;  %v1482_v51 = vsel %vm1481_vm9, %v1476_v49, %v1478_v46 }
  0xbb   : > { %3362 = vmatmul.mubr.msk.f32.vlgmr.msra.gmra.mrb[0].mxu1 %vm218_vm2, %v3254_v39 }
  0xbc   : > { %3365 = vmatpush3.msra.mxu1 %v1158_v34  ;;  %3366 = vmatprep.mubr.msk.f32.mxu1 %vm3618_vm0, %v3617_v0 }
  0xbd   : > { %3255 = vmatmul.mubr.msk.f32.vlgmr.msra.gmra.mrb[0].mxu0 %vm218_vm2, %v3254_v39  ;;  %3369 = vmatprep.subr.mxu1 %v3617_v0 }
  0xbe   : > { %1169 = vmatpush1.msra.mxu0 %v1160_v41  ;;  %1232 = vmatprep.mubr.f32.mxu0 %v3617_v0  ;;  %v1701_v41 = vld [vmem:[%s4054_s2] sm:$0xff] }
  0xbf   : > { %1329 = vmatprep.subr.mxu0 %v1322_v42 }
  0xc3   : > { %3367 = vmatmul.mubr.msk.f32.vlgmr.msra.gmra.mrb[0].mxu1 %vm218_vm2, %v3257_v44 }
  0xc4   : > { %3370 = vmatpush3.msra.mxu1 %v1319_v40  ;;  %3371 = vmatprep.mubr.msk.f32.mxu1 %vm3618_vm0, %v3617_v0 }
  0xc5   : > { %3258 = vmatmul.mubr.msk.f32.vlgmr.msra.gmra.mrb[0].mxu0 %vm218_vm2, %v3257_v44  ;;  %3374 = vmatprep.subr.mxu1 %v3617_v0 }
  0xc6   : > { %1330 = vmatpush1.msra.mxu0 %v1321_v47  ;;  %1393 = vmatprep.mubr.f32.mxu0 %v3617_v0  ;;  %v3274_v47 = vld [vmem:[%s4054_s2 + $0x10] sm:$0xff] }
  0xc7   : > { %1490 = vmatprep.subr.mxu0 %v1483_v48 }
  0xcb   : > { %3372 = vmatmul.mubr.msk.f32.vlgmr.msra.gmra.mrb[0].mxu1 %vm218_vm2, %v3260_v50 }
  0xcc   : > { %3375 = vmatpush3.msra.mxu1 %v1480_v45  ;;  %3376 = vmatprep.mubr.msk.f32.mxu1 %vm3618_vm0, %v3617_v0 }
  0xcd   : > { %3261 = vmatmul.mubr.msk.f32.vlgmr.msra.gmra.mrb[0].mxu0 %vm218_vm2, %v3260_v50  ;;  %3379 = vmatprep.subr.mxu1 %v3617_v0 }
  0xce   : > { %1491 = vmatpush1.msra.mxu0 %v1482_v51  ;;  %1554 = vmatprep.mubr.f32.mxu0 %v3617_v0 }
  0xd3   : > { %3377 = vmatmul.mubr.msk.f32.vlgmr.msra.gmra.mrb[0].mxu1 %vm218_vm2, %v3263_v52 }
  0xd4   : > { %3381 = vmatprep.mubr.msk.f32.mxu1 %vm3618_vm0, %v3617_v0 }
  0xd5   : > { %3264 = vmatmul.mubr.msk.f32.vlgmr.msra.gmra.mrb[0].mxu0 %vm218_vm2, %v3263_v52 }
  0xd6   : > { %1785 = vmatprep.mubr.f32.mxu0 %v3617_v0 }
 0x1a6   : > { %v1627_v53 = vpop.f32.mrb[0].mxu1 }
 0x1a7   : > { %v3268_v54 = vmul.f32 -1.442695, %v1627_v53  ;;  %v3378_v55 = vpop.f32.mrb[1].mxu1 }
 0x1a8   : > { %v1556_v56 = vpop.f32.mrb[0].mxu0 }
 0x1a9   : > { %3541 = vpow2.f32 %v3268_v54  ;;  %v3266_v57 = vmul.f32 -1.442695, %v1556_v56  ;;  %v1558_v58 = vpop.f32.mrb[1].mxu0  ;;  %v3277_v54 = vld [vmem:[%s4054_s2 + $0x18] sm:$0xff] }
 0x1aa   : > { %v3267_v59 = vmul.f32 -1.442695, %v1558_v58 }
 0x1ab   : > { %3543 = vpow2.f32 %v3266_v57 }
 0x1ac   : > { %3545 = vpow2.f32 %v3267_v59 }
 0x1b3   : > { %v3542_v60 = vpop.eup %3541 }
 0x1b4   : > { %v1645_v61 = vadd.f32 1.0, %v3542_v60  ;;  %v3280_v60 = vld [vmem:[%s4054_s2 + $0x20] sm:$0xff] }
 0x1b5   : > { %v3544_v62 = vpop.eup %3543 }
 0x1b6   : > { %v3546_v63 = vpop.eup %3545  ;;  %v1643_v4 = vadd.f32 1.0, %v3544_v62  ;;  %3547 = vrcp.f32 %v1645_v61 }
 0x1b7   : > { %v1644_v6 = vadd.f32 1.0, %v3546_v63 }
 0x1b8   : > { %3549 = vrcp.f32 %v1643_v4 }
 0x1b9   : > { %3551 = vrcp.f32 %v1644_v6 }
 0x1c0   : > { %v3548_v11 = vpop.eup %3547 }
 0x1c1   : > { %v1654_v19 = vmul.f32 %v3548_v11, %v1627_v53  ;;  %v3286_v11 = vld [vmem:[%s4054_s2 + $0x30] sm:$0xff] }
 0x1c2   : > { %v3550_v14 = vpop.eup %3549 }
 0x1c3   : > { %v3552_v16 = vpop.eup %3551  ;;  %v1652_v17 = vmul.f32 %v3550_v14, %v1556_v56  ;;  %v1673_v23 = vmul.f32 %v1667_v20, %v1654_v19  ;;  %v3292_v19 = vld [vmem:[%s4054_s2 + $0x40] sm:$0xff] }
 0x1c4   : > { %v1653_v18 = vmul.f32 %v3552_v16, %v1558_v58  ;;  %v3289_v16 = vld [vmem:[%s4054_s2 + $0x38] sm:$0xff] }
 0x1c5   : > { %v1671_v21 = vmul.f32 %v1659_v13, %v1652_v17 }
 0x1c6   : > { %v1672_v22 = vmul.f32 %v1663_v15, %v1653_v18 }
 0x1c7   : > { %1681 = vrot.lane.b32.xlu0 %v1671_v21, %s3627_s22 }
 0x1c8   : > { %1683 = vrot.lane.b32.xlu1 %v1672_v22, %s3627_s22 }
 0x1cb   : > { %1685 = vrot.lane.b32.xlu0 %v1673_v23, %s3627_s22 }
 0x239   : > { %v1682_v24 = vpop.permute.xlu0 %1681 }
 0x23a   : > { %1694 = vst.msk [vmem:[#allocation2] sm:$0xff] %vm1693_vm11, %v1682_v24  ;;  %v1684_v25 = vpop.permute.xlu1 %1683 }
 0x23b   : > { %v1688_v26 = vsel %vm1687_vm12, %v1682_v24, %v1684_v25 }
 0x23c   : > { %1709 = vrot.lane.b32.xlu1 %v1688_v26, %s3619_s6 }
 0x23d   : > { %v1686_v27 = vpop.permute.xlu0 %1685 }
 0x23e   : > { %v1689_v28 = vsel %vm1687_vm12, %v1684_v25, %v1686_v27 }
 0x23f   : > { %1697 = vst.msk [vmem:[#allocation2 + $0x10] sm:$0xff] %vm1696_vm13, %v1689_v28 }
 0x241   : > { %v1698_v29 = vld [vmem:[#allocation2] sm:$0xff] }
 0x242   : > { %1707 = vrot.lane.b32.xlu1 %v1698_v29, %s3619_s6 }
 0x246   : > { %v1700_v30 = vld [vmem:[#allocation2 + $0x10] sm:$0xff] }
 0x247   : > { %1711 = vrot.lane.b32.xlu0 %v1700_v30, %s3619_s6  ;;  %2012 = vrot.lane.b32.xlu1 %v1700_v30, %s3620_s7 }
 0x24b   : > { %2010 = vrot.lane.b32.xlu0 %v1688_v26, %s3620_s7  ;;  %2170 = vrot.lane.b32.xlu1 %v1688_v26, %s3621_s8 }
 0x24f   : > { %2008 = vrot.lane.b32.xlu0 %v1698_v29, %s3620_s7  ;;  %2168 = vrot.lane.b32.xlu1 %v1698_v29, %s3621_s8 }
 0x253   : > { %2172 = vrot.lane.b32.xlu0 %v1700_v30, %s3621_s8  ;;  %2332 = vrot.lane.b32.xlu1 %v1700_v30, %s3622_s9 }
 0x257   : > { %2330 = vrot.lane.b32.xlu0 %v1688_v26, %s3622_s9  ;;  %2490 = vrot.lane.b32.xlu1 %v1688_v26, %s3623_s10 }
 0x25b   : > { %2328 = vrot.lane.b32.xlu0 %v1698_v29, %s3622_s9  ;;  %2488 = vrot.lane.b32.xlu1 %v1698_v29, %s3623_s10 }
 0x25f   : > { %2492 = vrot.lane.b32.xlu0 %v1700_v30, %s3623_s10  ;;  %2652 = vrot.lane.b32.xlu1 %v1700_v30, %s3624_s11 }
 0x263   : > { %2650 = vrot.lane.b32.xlu0 %v1688_v26, %s3624_s11  ;;  %2810 = vrot.lane.b32.xlu1 %v1688_v26, %s3625_s12 }
 0x267   : > { %2648 = vrot.lane.b32.xlu0 %v1698_v29, %s3624_s11  ;;  %2808 = vrot.lane.b32.xlu1 %v1698_v29, %s3625_s12  ;;  %s3490_s11 = smul.u32 384, %s3675_s19 }
 0x269   : > { %s4009_s28 = scalar_lea.hbm %s4056_s4, %s3490_s11 }
 0x26b   : > { %2812 = vrot.lane.b32.xlu0 %v1700_v30, %s3625_s12  ;;  %2972 = vrot.lane.b32.xlu1 %v1700_v30, %s3626_s13 }
 0x26f   : > { %2970 = vrot.lane.b32.xlu0 %v1688_v26, %s3626_s13 }
 0x273   : > { %2968 = vrot.lane.b32.xlu0 %v1698_v29, %s3626_s13 }
 0x2ae   : > { %v1710_v31 = vpop.permute.xlu1 %1709 }
 0x2b4   : > { %v1708_v32 = vpop.permute.xlu1 %1707 }
 0x2b5   : > { %v1713_v37 = vsel %vm212_vm1, %v1708_v32, %v1710_v31 }
 0x2b9   : > { %v1712_v34 = vpop.permute.xlu0 %1711  ;;  %v2013_v35 = vpop.permute.xlu1 %2012 }
 0x2ba   : > { %3380 = vmatpush3.msra.mxu1 %v1712_v34  ;;  %v1714_v36 = vsel %vm212_vm1, %v1710_v31, %v1712_v34 }
 0x2bb   : > { %1721 = vmatprep.subr.mxu0 %v1714_v36  ;;  %3382 = vmatmul.mubr.msk.f32.vlgmr.msra.gmra.mrb[2].mxu1 %vm218_vm2, %v3269_v33 }
 0x2bc   : > { %3384 = vmatprep.subr.mxu1 %v3617_v0  ;;  %1722 = vmatpush1.msra.mxu0 %v1713_v37 }
 0x2bd   : > { %3385 = vmatpush3.msra.mxu1 %v1700_v30  ;;  %v2011_v38 = vpop.permute.xlu0 %2010  ;;  %3270 = vmatmul.mubr.msk.f32.vlgmr.msra.gmra.mrb[2].mxu0 %vm218_vm2, %v3269_v33  ;;  %v2171_v39 = vpop.permute.xlu1 %2170 }
 0x2be   : > { %1865 = vmatprep.subr.mxu0 %v1688_v26  ;;  %v2015_v40 = vsel %vm515_vm3, %v2011_v38, %v2013_v35  ;;  %3386 = vmatprep.mubr.msk.f32.mxu1 %vm3618_vm0, %v3617_v0 }
 0x2bf   : > { %1866 = vmatpush1.msra.mxu0 %v1698_v29  ;;  %3389 = vmatprep.subr.mxu1 %v3617_v0 }
 0x2c0   : > { %2022 = vmatprep.subr.mxu0 %v2015_v40  ;;  %1929 = vmatprep.mubr.f32.mxu0 %v3617_v0 }
 0x2c1   : > { %v2009_v42 = vpop.permute.xlu0 %2008  ;;  %v2169_v43 = vpop.permute.xlu1 %2168 }
 0x2c2   : > { %v2014_v44 = vsel %vm515_vm3, %v2009_v42, %v2011_v38  ;;  %v2174_v50 = vsel %vm676_vm4, %v2169_v43, %v2171_v39 }
 0x2c3   : > { %3387 = vmatmul.mubr.msk.f32.vlgmr.msra.gmra.mrb[2].mxu1 %vm218_vm2, %v1701_v41 }
 0x2c4   : > { %3390 = vmatpush3.msra.mxu1 %v2013_v35  ;;  %3391 = vmatprep.mubr.msk.f32.mxu1 %vm3618_vm0, %v3617_v0 }
 0x2c5   : > { %v2173_v45 = vpop.permute.xlu0 %2172  ;;  %3272 = vmatmul.mubr.msk.f32.vlgmr.msra.gmra.mrb[2].mxu0 %vm218_vm2, %v1701_v41  ;;  %3394 = vmatprep.subr.mxu1 %v3617_v0  ;;  %v2333_v49 = vpop.permute.xlu1 %2332 }
 0x2c6   : > { %2023 = vmatpush1.msra.mxu0 %v2014_v44  ;;  %v2175_v46 = vsel %vm676_vm4, %v2171_v39, %v2173_v45  ;;  %2086 = vmatprep.mubr.f32.mxu0 %v3617_v0 }
 0x2c7   : > { %2182 = vmatprep.subr.mxu0 %v2175_v46 }
 0x2c9   : > { %v2331_v48 = vpop.permute.xlu0 %2330  ;;  %v2491_v53 = vpop.permute.xlu1 %2490 }
 0x2ca   : > { %v2335_v52 = vsel %vm837_vm5, %v2331_v48, %v2333_v49 }
 0x2cb   : > { %3392 = vmatmul.mubr.msk.f32.vlgmr.msra.gmra.mrb[2].mxu1 %vm218_vm2, %v3274_v47 }
 0x2cc   : > { %3395 = vmatpush3.msra.mxu1 %v2173_v45  ;;  %3396 = vmatprep.mubr.msk.f32.mxu1 %vm3618_vm0, %v3617_v0 }
 0x2cd   : > { %v2329_v51 = vpop.permute.xlu0 %2328  ;;  %3275 = vmatmul.mubr.msk.f32.vlgmr.msra.gmra.mrb[2].mxu0 %vm218_vm2, %v3274_v47  ;;  %3399 = vmatprep.subr.mxu1 %v3617_v0  ;;  %v2489_v57 = vpop.permute.xlu1 %2488 }
 0x2ce   : > { %2183 = vmatpush1.msra.mxu0 %v2174_v50  ;;  %2246 = vmatprep.mubr.f32.mxu0 %v3617_v0  ;;  %v2334_v56 = vsel %vm837_vm5, %v2329_v51, %v2331_v48  ;;  %v2494_v62 = vsel %vm998_vm6, %v2489_v57, %v2491_v53 }
 0x2cf   : > { %2342 = vmatprep.subr.mxu0 %v2335_v52 }
 0x2d1   : > { %v2493_v55 = vpop.permute.xlu0 %2492  ;;  %v2653_v61 = vpop.permute.xlu1 %2652 }
 0x2d2   : > { %v2495_v58 = vsel %vm998_vm6, %v2491_v53, %v2493_v55 }
 0x2d3   : > { %3397 = vmatmul.mubr.msk.f32.vlgmr.msra.gmra.mrb[2].mxu1 %vm218_vm2, %v3277_v54 }
 0x2d4   : > { %3400 = vmatpush3.msra.mxu1 %v2333_v49  ;;  %3401 = vmatprep.mubr.msk.f32.mxu1 %vm3618_vm0, %v3617_v0 }
 0x2d5   : > { %3278 = vmatmul.mubr.msk.f32.vlgmr.msra.gmra.mrb[2].mxu0 %vm218_vm2, %v3277_v54  ;;  %3404 = vmatprep.subr.mxu1 %v3617_v0  ;;  %v2651_v59 = vpop.permute.xlu0 %2650  ;;  %v2811_v6 = vpop.permute.xlu1 %2810 }
 0x2d6   : > { %2343 = vmatpush1.msra.mxu0 %v2334_v56  ;;  %2406 = vmatprep.mubr.f32.mxu0 %v3617_v0  ;;  %v2655_v4 = vsel %vm1159_vm7, %v2651_v59, %v2653_v61 }
 0x2d7   : > { %2502 = vmatprep.subr.mxu0 %v2495_v58 }
 0x2d9   : > { %v2649_v63 = vpop.permute.xlu0 %2648  ;;  %v2809_v10 = vpop.permute.xlu1 %2808 }
 0x2da   : > { %v2654_v8 = vsel %vm1159_vm7, %v2649_v63, %v2651_v59  ;;  %v2814_v13 = vsel %vm1320_vm8, %v2809_v10, %v2811_v6 }
 0x2db   : > { %3402 = vmatmul.mubr.msk.f32.vlgmr.msra.gmra.mrb[2].mxu1 %vm218_vm2, %v3280_v60 }
 0x2dc   : > { %3405 = vmatpush3.msra.mxu1 %v2493_v55  ;;  %3406 = vmatprep.mubr.msk.f32.mxu1 %vm3618_vm0, %v3617_v0 }
 0x2dd   : > { %3281 = vmatmul.mubr.msk.f32.vlgmr.msra.gmra.mrb[2].mxu0 %vm218_vm2, %v3280_v60  ;;  %3409 = vmatprep.subr.mxu1 %v3617_v0  ;;  %v2813_v7 = vpop.permute.xlu0 %2812  ;;  %v2973_v14 = vpop.permute.xlu1 %2972 }
 0x2de   : > { %2503 = vmatpush1.msra.mxu0 %v2494_v62  ;;  %2566 = vmatprep.mubr.f32.mxu0 %v3617_v0  ;;  %v2815_v9 = vsel %vm1320_vm8, %v2811_v6, %v2813_v7 }
 0x2df   : > { %2662 = vmatprep.subr.mxu0 %v2655_v4 }
 0x2e1   : > { %v2971_v12 = vpop.permute.xlu0 %2970 }
 0x2e2   : > { %v2975_v15 = vsel %vm1481_vm9, %v2971_v12, %v2973_v14 }
 0x2e3   : > { %3407 = vmatmul.mubr.msk.f32.vlgmr.msra.gmra.mrb[2].mxu1 %vm218_vm2, %v3283_v5 }
 0x2e4   : > { %3410 = vmatpush3.msra.mxu1 %v2653_v61  ;;  %3411 = vmatprep.mubr.msk.f32.mxu1 %vm3618_vm0, %v3617_v0 }
 0x2e5   : > { %3284 = vmatmul.mubr.msk.f32.vlgmr.msra.gmra.mrb[2].mxu0 %vm218_vm2, %v3283_v5  ;;  %3414 = vmatprep.subr.mxu1 %v3617_v0  ;;  %v2969_v17 = vpop.permute.xlu0 %2968 }
 0x2e6   : > { %2663 = vmatpush1.msra.mxu0 %v2654_v8  ;;  %2726 = vmatprep.mubr.f32.mxu0 %v3617_v0  ;;  %v2974_v18 = vsel %vm1481_vm9, %v2969_v17, %v2971_v12 }
 0x2e7   : > { %2822 = vmatprep.subr.mxu0 %v2815_v9 }
 0x2eb   : > { %3412 = vmatmul.mubr.msk.f32.vlgmr.msra.gmra.mrb[2].mxu1 %vm218_vm2, %v3286_v11 }
 0x2ec   : > { %3415 = vmatpush3.msra.mxu1 %v2813_v7  ;;  %3416 = vmatprep.mubr.msk.f32.mxu1 %vm3618_vm0, %v3617_v0 }
 0x2ed   : > { %3287 = vmatmul.mubr.msk.f32.vlgmr.msra.gmra.mrb[2].mxu0 %vm218_vm2, %v3286_v11  ;;  %3419 = vmatprep.subr.mxu1 %v3617_v0 }
 0x2ee   : > { %2823 = vmatpush1.msra.mxu0 %v2814_v13  ;;  %2886 = vmatprep.mubr.f32.mxu0 %v3617_v0 }
 0x2ef   : > { %2982 = vmatprep.subr.mxu0 %v2975_v15 }
 0x2f3   : > { %3417 = vmatmul.mubr.msk.f32.vlgmr.msra.gmra.mrb[2].mxu1 %vm218_vm2, %v3289_v16 }
 0x2f4   : > { %3420 = vmatpush3.msra.mxu1 %v2973_v14  ;;  %3421 = vmatprep.mubr.msk.f32.mxu1 %vm3618_vm0, %v3617_v0 }
 0x2f5   : > { %3290 = vmatmul.mubr.msk.f32.vlgmr.msra.gmra.mrb[2].mxu0 %vm218_vm2, %v3289_v16 }
 0x2f6   : > { %2983 = vmatpush1.msra.mxu0 %v2974_v18  ;;  %3046 = vmatprep.mubr.f32.mxu0 %v3617_v0 }
 0x2fb   : > { %3422 = vmatmul.mubr.msk.f32.vlgmr.msra.gmra.mrb[2].mxu1 %vm218_vm2, %v3292_v19 }
 0x2fd   : > { %3293 = vmatmul.mubr.msk.f32.vlgmr.msra.gmra.mrb[2].mxu0 %vm218_vm2, %v3292_v19 }
 0x3ce   : > { %v3119_v20 = vpop.f32.mrb[2].mxu1 }
 0x3cf   : > { %v3423_v21 = vpop.f32.mrb[3].mxu1 }
 0x3d0   : > { %v3048_v22 = vpop.f32.mrb[2].mxu0 }
 0x3d1   : > { %3129 = vrot.lane.b32.xlu1 %v3048_v22, %s3627_s22  ;;  %v3050_v23 = vpop.f32.mrb[3].mxu0 }
 0x3d2   : > { %3131 = vrot.lane.b32.xlu0 %v3050_v23, %s3627_s22 }
 0x3d5   : > { %3133 = vrot.lane.b32.xlu1 %v3119_v20, %s3627_s22  ;;  %s188_s22 = sand.u32 1, %s3607_s16  }
 0x3d6   : > { %s3488_s10 = smul.u32 24, %s188_s22  ;;  %s3162_s19 = scalar_lea.sflag [#allocation4], %s188_s22 }
 0x3d8   : > { %s190_s12 = scalar_lea.vmem [#allocation3], %s3488_s10 }
 0x3d9   : > { %s3176_s13 = sshll.u32 %s190_s12, 4  ;;  %s4011_s13 = int_to_ptr.vmem [resolvable:$true] %s3176_s13 }
 0x3da   : > { %p3560_p0 = scmp.lt.s32.totalorder %s4011_s13, %s3558_s30 }
 0x443   : > { %v3130_v0 = vpop.permute.xlu1 %3129 }
 0x444   : > { %v3140_v24 = vadd.f32 %v3130_v0, %v3714_v2  ;;  %v3132_v25 = vpop.permute.xlu0 %3131 }
 0x445   : > { %v3135_v26 = vsel %vm1687_vm12, %v3130_v0, %v3132_v25 }
 0x446   : > { %v3141_v27 = vadd.f32 %v3135_v26, %v3712_v1  ;;  %3146 = vrot.lane.b32.xlu0 %v3140_v24, %s3622_s9 }
 0x447   : > { %v3134_v28 = vpop.permute.xlu1 %3133 }
 0x448   : > { %v3136_v29 = vsel %vm1687_vm12, %v3132_v25, %v3134_v28  ;;  %3148 = vrot.lane.b32.xlu1 %v3141_v27, %s3622_s9 }
 0x449   : > { %v3142_v30 = vadd.f32 %v3136_v29, %v3720_v3 }
 0x44b   : > { %3150 = vrot.lane.b32.xlu0 %v3142_v30, %s3622_s9  ;;  %s3553_s9 = scalar_lea.vmem %s4011_s13, 384 }
 0x44c   : > { %p3554_p11 = scmp.ne.s32.totalorder %s4011_s13, %s3553_s9  ;;  %p3561_p1 = scmp.lt.s32.totalorder %s3559_s5, %s3553_s9 }
 0x44e   : > { %p3555_p12 = pnand %p3554_p11, %p3692_p5  ;;  %p3562_p2 = por %p3561_p1, %p3560_p0 }
 0x450   : > { %p3556_p13 = pneg %p3555_p12 }
 0x452   : > { %p3563_p3 = pnand %p3562_p2, %p3556_p13 }
 0x4b8   : > { %v3147_v31 = vpop.permute.xlu0 %3146 }
 0x4ba   : > { %v3149_v2 = vpop.permute.xlu1 %3148 }
 0x4bb   : > { %v3152_v1 = vsel %vm837_vm5, %v3147_v31, %v3149_v2 }
 0x4bc   : > { %3157 = vst [vmem:[%s190_s12] sm:$0xff] %v3152_v1 }
 0x4bd   : > { %v3151_v32 = vpop.permute.xlu0 %3150 }
 0x4be   : > { %v3153_v3 = vsel %vm837_vm5, %v3149_v2, %v3151_v32  ;;  %3160 = vst.msk [vmem:[%s190_s12 + $0x10] sm:$0xff] %vm3159_vm14, %v3151_v32 }
 0x4bf   : > { %3158 = vst [vmem:[%s190_s12 + $0x8] sm:$0xff] %v3153_v3 }
 0x4c0   : > { %3566 = shalt.err (!%p3563_p3)
}
 0x4c1   : > { %s3567_s14 = scalar_lea.hbm %s4009_s28, 384  ;;  %s3571_s7 = scalar_lea.hbm %s4056_s4, 768 }
 0x4c2   : > { %p3568_p4 = scmp.ne.s32.totalorder %s4009_s28, %s3567_s14  ;;  %p3572_p9 = scmp.lt.u32.totalorder %s4009_s28, %s4056_s4 }
 0x4c3   : > { %p3573_p10 = scmp.lt.u32.totalorder %s3571_s7, %s3567_s14  ;;  %p3575_p12 = scmp.lt.u32.totalorder %s3567_s14, %s4009_s28 }
 0x4c4   : > { %p3569_p7 = pnand %p3568_p4, %p3692_p5 }
 0x4c5   : > { %p3574_p11 = por %p3573_p10, %p3572_p9 }
 0x4c6   : > { %p3570_p8 = pneg %p3569_p7 }
 0x4c7   : > { %p3576_p13 = por %p3575_p12, %p3574_p11 }
 0x4c9   : > { %p3577_p0 = pnand %p3576_p13, %p3570_p8 }
 0x4cb   : > { %3580 = shalt.err (!%p3577_p0)
}
 0x4cc   : > { %3491 = dma.vmem_to_hbm [thread:$0]  (%p3692_p5), %s4011_s13, 384, %s4009_s28, %s3162_s19  }
 0x4cd PF: > { %p3497_p1 = scmp.ge.s32.totalorder %s3615_s18, 2  ;;  %s3188_s10 = sand.u32 1, %s3603_s15  }
 0x4ce   : > { %s3189_s11 = scalar_lea.sflag [#allocation4], %s3188_s10 }
 0x4cf   : > { %p3494_p2 = pnand %p3497_p1, %p3696_p6 }
 0x4d1   : > { %3598 = dma.done.wait (!%p3494_p2), %s3189_s11, 384  }
 0x4d2   : > { %3600 = vsyncadd (!%p3494_p2), %s3189_s11, 4294966912  ;;  %p14_p3 = scmp.ge.s32.totalorder %s3679_s21, 4   ;;  %s4059_s15 = smov %s3607_s16 }
 0x4d3   : > { %s4060_s16 = smov %s3611_s17  ;;  %s4061_s17 = smov %s3690_s24 }
 0x4d4   : > { %s4062_s18 = smov %s3679_s21  ;;  %16 = sbr.rel (!%p14_p3) target bundleno = 3 (0x3), region = 87 }
 0x4db   :  { %3194 = vsyncpa [#allocation4], 1 }
 0x4dc   :  { %3196 = vsyncpa [#allocation4 + $0x1], 1 }

</bundles_post_ra>
